<compile_context>
chip_gen: v7x
topology: tpu7x:2x2x1
jax: 0.10.0
libtpu: 0.0.40
codegen_flags: <defaults>
</compile_context>

<pallas_src>
from typing import NamedTuple

import jax
import jax.numpy as jnp
from jax.experimental import pallas as pl
from jax.experimental.pallas import tpu as pltpu


# ------------------------------ configuration ------------------------------ #

def _round_up(n, m):
    return ((n + m - 1) // m) * m


class DecoderConfig(NamedTuple):
    output_dim: int
    emb_dim: int
    hid_dim: int
    n_layers: int
    vocab_pad: int
    emb_pad: int
    hid_pad: int


def make_config(output_dim, emb_dim, hid_dim, n_layers):
    return DecoderConfig(
        output_dim, emb_dim, hid_dim, n_layers,
        _round_up(output_dim, 128),
        _round_up(emb_dim, 128),
        _round_up(hid_dim, 128),
    )


def _pick_vocab_tile(vocab_pad, max_tile=512):
    for cand in (max_tile, 256, 128):
        if cand <= vocab_pad and vocab_pad % cand == 0:
            return cand
    return vocab_pad


# ------------------------------ fused kernel ------------------------------- #

def _make_decoder_kernel(n_layers, batch_pad, vocab_pad):
    """grid = (vocab_tiles, time_steps); weights resident, hidden in scratch."""

    def kernel(*refs):
        tok_ref = refs[0]                       # (B, T) int32, SMEM
        emb_ref = refs[1]                       # (V_pad, E_pad) f32, resident
        h0_ref = refs[2]                        # (L, B, H) f32, resident
        out_w_ref = refs[3 + 2 * n_layers]      # (H, TV) bf16 tile
        out_b_ref = refs[4 + 2 * n_layers]      # (1, TV) f32 tile
        pred_ref = refs[5 + 2 * n_layers]       # (1, B, TV) f32 out tile
        hout_ref = refs[6 + 2 * n_layers]       # (L, B, H) f32 out (resident)
        x_all_ref = refs[7 + 2 * n_layers]      # (T, B, H) bf16 scratch
        h_scr_ref = refs[8 + 2 * n_layers]      # (L, B, H) f32 scratch (carry)

        v = pl.program_id(0)                    # vocab tile (outer)
        t = pl.program_id(1)                    # time step (inner)
        num_t = pl.num_programs(1)

        @pl.when(jnp.logical_and(v == 0, t == 0))
        def _load_hidden():
            h_scr_ref[...] = h0_ref[...]

        @pl.when(v == 0)
        def _rnn_step():
            # Embedding lookup: per-row dynamic gather from the resident f32
            # table, driven by SMEM token scalars (clamped to stay in bounds).
            rows = []
            for b in range(batch_pad):
                idx = jnp.clip(tok_ref[b, t], 0, vocab_pad - 1)
                rows.append(emb_ref[pl.ds(idx, 1), :])        # (1, E_pad) f32
            x = jnp.concatenate(rows, axis=0).astype(jnp.bfloat16)   # (B, E_pad)

            # Multi-layer Elman RNN, single time step, hidden carried in VMEM.
            for l in range(n_layers):
                w_cat_ref = refs[3 + 2 * l]     # (in_pad + H, H) bf16
                bias_ref = refs[4 + 2 * l]      # (1, H) f32 (= b_ih + b_hh)
                h_prev = h_scr_ref[l].astype(jnp.bfloat16)    # (B, H)
                xh = jnp.concatenate([x, h_prev], axis=1)     # (B, in_pad + H)
                z = (jnp.dot(xh, w_cat_ref[...],
                             preferred_element_type=jnp.float32)
                     + bias_ref[...])
                h_new = jnp.tanh(z)                           # f32 (EUP)
                h_scr_ref[l] = h_new
                x = h_new.astype(jnp.bfloat16)                # next layer input

            x_all_ref[t] = x                    # stash for remaining vocab tiles

            @pl.when(t == num_t - 1)
            def _store_hidden():                # single HBM writeback at the end
                hout_ref[...] = h_scr_ref[...]

        # Output projection for this (vocab tile, time step): lane-dense tile.
        pred_ref[0] = (jnp.dot(x_all_ref[t], out_w_ref[...],
                               preferred_element_type=jnp.float32)
                       + out_b_ref[...])

    return kernel


# ----------------------------- parameter packing --------------------------- #

def init_decoder_params(key, output_dim, emb_dim, hid_dim, n_layers):
    """Raw (logical-shape) parameters with PyTorch-style initializers."""
    keys = jax.random.split(key, 3 + 4 * n_layers)
    params = {}
    params["embedding"] = jax.random.normal(keys[0], (output_dim, emb_dim),
                                            jnp.float32)
    k = 1.0 / jnp.sqrt(jnp.float32(hid_dim))
    for l in range(n_layers):
        in_dim = emb_dim if l == 0 else hid_dim
        kk = keys[1 + 4 * l: 1 + 4 * (l + 1)]
        params[f"w_ih_{l}"] = jax.random.uniform(kk[0], (hid_dim, in_dim),
                                                 jnp.float32, -k, k)
        params[f"w_hh_{l}"] = jax.random.uniform(kk[1], (hid_dim, hid_dim),
                                                 jnp.float32, -k, k)
        params[f"b_ih_{l}"] = jax.random.uniform(kk[2], (hid_dim,),
                                                 jnp.float32, -k, k)
        params[f"b_hh_{l}"] = jax.random.uniform(kk[3], (hid_dim,),
                                                 jnp.float32, -k, k)
    params["out_w"] = jax.random.uniform(keys[-2], (output_dim, hid_dim),
                                         jnp.float32, -k, k)
    params["out_b"] = jax.random.uniform(keys[-1], (output_dim,),
                                         jnp.float32, -k, k)
    return params


def _pad2(a, rows, cols):
    return jnp.pad(a, ((0, rows - a.shape[0]), (0, cols - a.shape[1])))


def pack_params(raw, cfg):
    """Pre-transpose, zero-pad to lane-dense shapes, concat w_ih|w_hh, fuse biases."""
    packed = {}
    packed["emb"] = _pad2(raw["embedding"], cfg.vocab_pad, cfg.emb_pad)  # f32
    for l in range(cfg.n_layers):
        in_pad = cfg.emb_pad if l == 0 else cfg.hid_pad
        w_ih_t = _pad2(raw[f"w_ih_{l}"].T, in_pad, cfg.hid_pad)
        w_hh_t = _pad2(raw[f"w_hh_{l}"].T, cfg.hid_pad, cfg.hid_pad)
        packed[f"w_cat_t_{l}"] = jnp.concatenate([w_ih_t, w_hh_t],
                                                 axis=0).astype(jnp.bfloat16)
        bias = (raw[f"b_ih_{l}"] + raw[f"b_hh_{l}"]).reshape(1, -1)
        packed[f"b_{l}"] = _pad2(bias, 1, cfg.hid_pad)                   # f32
    packed["out_w_t"] = _pad2(raw["out_w"].T, cfg.hid_pad,
                              cfg.vocab_pad).astype(jnp.bfloat16)
    packed["out_b"] = _pad2(raw["out_b"].reshape(1, -1), 1, cfg.vocab_pad)
    return packed


# ------------------------------ VMEM budgeting ------------------------------ #

def _vmem_limit_bytes(cfg, batch_pad, T, tv):
    f32, bf16 = 4, 2
    resident = cfg.vocab_pad * cfg.emb_pad * f32                 # emb table
    resident += cfg.n_layers * batch_pad * cfg.hid_pad * f32 * 2  # h0 + h_out
    for l in range(cfg.n_layers):
        in_pad = cfg.emb_pad if l == 0 else cfg.hid_pad
        resident += (in_pad + cfg.hid_pad) * cfg.hid_pad * bf16
        resident += cfg.hid_pad * f32
    per_tile = cfg.hid_pad * tv * bf16 + tv * f32 + batch_pad * tv * f32
    scratch = (T * batch_pad * cfg.hid_pad * bf16
               + cfg.n_layers * batch_pad * cfg.hid_pad * f32)
    total = 2 * resident + 2 * per_tile + scratch + (4 << 20)
    return int(min(100 << 20, max(16 << 20, total)))


# ------------------------------ decoder forward ----------------------------- #

def decoder_steps(cfg, packed, tokens, hidden, *, max_vocab_tile=512):
    """Run T fused decode steps inside one pallas_call.

    tokens: (T, batch) int32 (tokens fed at each step, teacher-forced)
    hidden: (n_layers, batch, hid_dim) f32
    Returns (predictions (T, batch, output_dim), new_hidden (n_layers, batch, hid_dim)).
    """
    T, batch = tokens.shape
    batch_pad = _round_up(batch, 16)          # bf16 sublane packing
    tv = _pick_vocab_tile(cfg.vocab_pad, max_vocab_tile)
    nv = cfg.vocab_pad // tv

    # Token ids live in SMEM: (batch_pad, T) so the long axis is last.
    tok = jnp.pad(tokens.astype(jnp.int32),
                  ((0, 0), (0, batch_pad - batch))).T            # (B_pad, T)
    h0 = jnp.pad(hidden.astype(jnp.float32),
                 ((0, 0), (0, batch_pad - batch),
                  (0, cfg.hid_pad - cfg.hid_dim)))

    layer_args = []
    for l in range(cfg.n_layers):
        layer_args += [packed[f"w_cat_t_{l}"], packed[f"b_{l}"]]

    in_specs = [
        pl.BlockSpec(memory_space=pltpu.MemorySpace.SMEM),                    # tok
        pl.BlockSpec((cfg.vocab_pad, cfg.emb_pad), lambda v, t: (0, 0)),      # emb
        pl.BlockSpec((cfg.n_layers, batch_pad, cfg.hid_pad),
                     lambda v, t: (0, 0, 0)),                                 # h0
    ]
    for l in range(cfg.n_layers):
        in_pad = cfg.emb_pad if l == 0 else cfg.hid_pad
        in_specs.append(pl.BlockSpec((in_pad + cfg.hid_pad, cfg.hid_pad),
                                     lambda v, t: (0, 0)))                    # w_cat
        in_specs.append(pl.BlockSpec((1, cfg.hid_pad), lambda v, t: (0, 0)))  # bias
    in_specs += [
        pl.BlockSpec((cfg.hid_pad, tv), lambda v, t: (0, v)),                 # out_w
        pl.BlockSpec((1, tv), lambda v, t: (0, v)),                           # out_b
    ]
    out_specs = (
        pl.BlockSpec((1, batch_pad, tv), lambda v, t: (t, 0, v)),             # pred
        pl.BlockSpec((cfg.n_layers, batch_pad, cfg.hid_pad),
                     lambda v, t: (0, 0, 0)),                                 # h_out
    )
    out_shape = (
        jax.ShapeDtypeStruct((T, batch_pad, cfg.vocab_pad), jnp.float32),
        jax.ShapeDtypeStruct((cfg.n_layers, batch_pad, cfg.hid_pad),
                             jnp.float32),
    )

    pred_pad, h_new_pad = pl.pallas_call(
        _make_decoder_kernel(cfg.n_layers, batch_pad, cfg.vocab_pad),
        grid=(nv, T),
        in_specs=in_specs,
        out_specs=out_specs,
        out_shape=out_shape,
        scratch_shapes=[
            pltpu.VMEM((T, batch_pad, cfg.hid_pad), jnp.bfloat16),   # x stash
            pltpu.VMEM((cfg.n_layers, batch_pad, cfg.hid_pad),
                       jnp.float32),                                 # h carry
        ],
        compiler_params=pltpu.CompilerParams(
            # Both axes sequential: time carries the hidden state; the vocab
            # axis depends on scratch written at tile 0 (see TODO on v7x).
            dimension_semantics=("arbitrary", "arbitrary"),
            vmem_limit_bytes=_vmem_limit_bytes(cfg, batch_pad, T, tv),
        ),
    )(tok, packed["emb"], h0, *layer_args, packed["out_w_t"], packed["out_b"])

    return (pred_pad[:, :batch, :cfg.output_dim],
            h_new_pad[:, :batch, :cfg.hid_dim])


def decoder_forward(cfg, packed, tokens, hidden):
    """Single-step forward matching the PyTorch Decoder.forward (eval mode)."""
    preds, h_new = decoder_steps(cfg, packed, tokens[None, :], hidden)
    return preds[0], h_new


# ------------------------------ pure-JAX reference -------------------------- #

def reference_steps(cfg, packed, tokens, hidden):
    """Mirror of the kernel math (same bf16 casts) in plain JAX."""
    HI = jax.lax.Precision.HIGHEST
    T, _ = tokens.shape
    hp = jnp.pad(hidden.astype(jnp.float32),
                 ((0, 0), (0, 0), (0, cfg.hid_pad - cfg.hid_dim)))
    preds = []
    for t in range(T):
        ids = jnp.clip(tokens[t].astype(jnp.int32), 0, cfg.vocab_pad - 1)
        x = packed["emb"][ids].astype(jnp.bfloat16)
        new_h = []
        for l in range(cfg.n_layers):
            w = packed[f"w_cat_t_{l}"].astype(jnp.float32)
            b = packed[f"b_{l}"]
            h_bf = hp[l].astype(jnp.bfloat16)
            xh = jnp.concatenate([x, h_bf], axis=1).astype(jnp.float32)
            hn = jnp.tanh(jnp.dot(xh, w, precision=HI) + b)
            new_h.append(hn)
            x = hn.astype(jnp.bfloat16)
        hp = jnp.stack(new_h, axis=0)
        pred = (jnp.dot(x.astype(jnp.float32),
                        packed["out_w_t"].astype(jnp.float32), precision=HI)
                + packed["out_b"])
        preds.append(pred)
    preds = jnp.stack(preds, axis=0)
    return preds[:, :, :cfg.output_dim], hp[:, :, :cfg.hid_dim]


# ---------------------------------- driver ---------------------------------- #

if __name__ == "__main__":
    output_dim = 64   # vocab size
    emb_dim = 32
    hid_dim = 64
    n_layers = 2
    batch = 8
    T = 4

    root = jax.random.PRNGKey(0)
    k_params, k_tok, k_hid, k_seq = jax.random.split(root, 4)

    cfg = make_config(output_dim, emb_dim, hid_dim, n_layers)
    raw = init_decoder_params(k_params, output_dim, emb_dim, hid_dim, n_layers)
    packed = pack_params(raw, cfg)

    tokens = jax.random.randint(k_tok, (batch,), 0, output_dim, jnp.int32)
    hidden = jax.random.normal(k_hid, (n_layers, batch, hid_dim), jnp.float32)

    # --- single step (exact PyTorch Decoder.forward semantics) ---
    fwd = jax.jit(lambda p, tk, h: decoder_forward(cfg, p, tk, h))
    prediction, new_hidden = fwd(packed, tokens, hidden)
    jax.block_until_ready((prediction, new_hidden))

    assert prediction.shape == (batch, output_dim)
    assert new_hidden.shape == (n_layers, batch, hid_dim)

    ref_pred, ref_hidden = reference_steps(cfg, packed, tokens[None, :], hidden)
    assert jnp.allclose(prediction, ref_pred[0], atol=2e-3, rtol=2e-3)
    assert jnp.allclose(new_hidden, ref_hidden, atol=2e-3, rtol=2e-3)

    # --- multi-step fused decode (time loop inside the kernel) ---
    tok_seq = jax.random.randint(k_seq, (T, batch), 0, output_dim, jnp.int32)
    dec = jax.jit(lambda p, tk, h: decoder_steps(cfg, p, tk, h))
    preds_seq, hidden_T = dec(packed, tok_seq, hidden)
    jax.block_until_ready((preds_seq, hidden_T))

    assert preds_seq.shape == (T, batch, output_dim)
    assert hidden_T.shape == (n_layers, batch, hid_dim)

    ref_preds_seq, ref_hidden_T = reference_steps(cfg, packed, tok_seq, hidden)
    assert jnp.allclose(preds_seq, ref_preds_seq, atol=2e-3, rtol=2e-3)
    assert jnp.allclose(hidden_T, ref_hidden_T, atol=2e-3, rtol=2e-3)

    print("KERNEL_OK")
</pallas_src>

<mosaic_0001>
module attributes {stable_mosaic.version = 11 : i64} {
  func.func @kernel(%arg0: i32, %arg1: i32, %arg2: memref<16x1xi32, #tpu.memory_space<smem>>, %arg3: memref<128x128xf32, #tpu.memory_space<vmem>>, %arg4: memref<2x16x128xf32, #tpu.memory_space<vmem>>, %arg5: memref<256x128xbf16, #tpu.memory_space<vmem>>, %arg6: memref<1x128xf32, #tpu.memory_space<vmem>>, %arg7: memref<256x128xbf16, #tpu.memory_space<vmem>>, %arg8: memref<1x128xf32, #tpu.memory_space<vmem>>, %arg9: memref<128x128xbf16, #tpu.memory_space<vmem>>, %arg10: memref<1x128xf32, #tpu.memory_space<vmem>>, %arg11: memref<1x16x128xf32, #tpu.memory_space<vmem>>, %arg12: memref<2x16x128xf32, #tpu.memory_space<vmem>>, %arg13: memref<1x16x128xbf16, #tpu.memory_space<vmem>>, %arg14: memref<2x16x128xf32, #tpu.memory_space<vmem>>) attributes {dimension_semantics = [#tpu.dimension_semantics<arbitrary>, #tpu.dimension_semantics<arbitrary>], iteration_bounds = array<i64: 1, 1>, scalar_prefetch = 0 : i64, scratch_operands = 2 : i64, tpu.core_type = #tpu.core_type<tc>, window_params = [{transform_indices = @transform_0, window_bounds = array<i64: 16, 1>}, {pipeline_mode = #tpu.pipeline_mode<synchronous>, transform_indices = @transform_1, window_bounds = array<i64: 128, 128>}, {pipeline_mode = #tpu.pipeline_mode<synchronous>, transform_indices = @transform_2, window_bounds = array<i64: 2, 16, 128>}, {pipeline_mode = #tpu.pipeline_mode<synchronous>, transform_indices = @transform_3, window_bounds = array<i64: 256, 128>}, {pipeline_mode = #tpu.pipeline_mode<synchronous>, transform_indices = @transform_4, window_bounds = array<i64: 1, 128>}, {pipeline_mode = #tpu.pipeline_mode<synchronous>, transform_indices = @transform_5, window_bounds = array<i64: 256, 128>}, {pipeline_mode = #tpu.pipeline_mode<synchronous>, transform_indices = @transform_6, window_bounds = array<i64: 1, 128>}, {transform_indices = @transform_7, window_bounds = array<i64: 128, 128>}, {transform_indices = @transform_8, window_bounds = array<i64: 1, 128>}, {transform_indices = @transform_9, window_bounds = array<i64: 1, 16, 128>}, {pipeline_mode = #tpu.pipeline_mode<synchronous>, transform_indices = @transform_10, window_bounds = array<i64: 2, 16, 128>}]} {
    %c0_i32 = arith.constant 0 : i32
    %0 = arith.cmpi eq, %arg0, %c0_i32 : i32
    %c0_i32_0 = arith.constant 0 : i32
    %1 = arith.cmpi eq, %arg1, %c0_i32_0 : i32
    %2 = arith.andi %0, %1 : i1
    %3 = arith.extui %2 : i1 to i32
    %c0_i32_1 = arith.constant 0 : i32
    %4 = arith.cmpi ne, %3, %c0_i32_1 : i32
    scf.if %4 {
      %c0_12 = arith.constant 0 : index
      %c0_13 = arith.constant 0 : index
      %c0_14 = arith.constant 0 : index
      %19 = vector.load %arg4[%c0_12, %c0_13, %c0_14] : memref<2x16x128xf32, #tpu.memory_space<vmem>>, vector<2x16x128xf32>
      %c0_15 = arith.constant 0 : index
      %c0_16 = arith.constant 0 : index
      %c0_17 = arith.constant 0 : index
      %20 = vector.load %arg14[%c0_15, %c0_16, %c0_17] : memref<2x16x128xf32, #tpu.memory_space<vmem>>, vector<2x16x128xf32>
      tpu.vector_store %arg14[%c0_15, %c0_16, %c0_17], %19 {strides = array<i32>} : memref<2x16x128xf32, #tpu.memory_space<vmem>>, vector<2x16x128xf32>,
    } else {
    }
    %c0_i32_2 = arith.constant 0 : i32
    %5 = arith.cmpi eq, %arg0, %c0_i32_2 : i32
    %6 = arith.extui %5 : i1 to i32
    %c0_i32_3 = arith.constant 0 : i32
    %7 = arith.cmpi ne, %6, %c0_i32_3 : i32
    scf.if %7 {
      %c0_12 = arith.constant 0 : index
      %19 = arith.index_cast %arg1 : i32 to index
      %20 = memref.load %arg2[%c0_12, %19] : memref<16x1xi32, #tpu.memory_space<smem>>
      %c0_i32_13 = arith.constant 0 : i32
      %c127_i32 = arith.constant 127 : i32
      %21 = arith.maxsi %c0_i32_13, %20 : i32
      %22 = arith.minsi %c127_i32, %21 : i32
      %23 = arith.index_cast %22 : i32 to index
      %c0_14 = arith.constant 0 : index
      %24 = vector.load %arg3[%23, %c0_14] : memref<128x128xf32, #tpu.memory_space<vmem>>, vector<1x128xf32>
      %c1 = arith.constant 1 : index
      %25 = arith.index_cast %arg1 : i32 to index
      %26 = memref.load %arg2[%c1, %25] : memref<16x1xi32, #tpu.memory_space<smem>>
      %c0_i32_15 = arith.constant 0 : i32
      %c127_i32_16 = arith.constant 127 : i32
      %27 = arith.maxsi %c0_i32_15, %26 : i32
      %28 = arith.minsi %c127_i32_16, %27 : i32
      %29 = arith.index_cast %28 : i32 to index
      %c0_17 = arith.constant 0 : index
      %30 = vector.load %arg3[%29, %c0_17] : memref<128x128xf32, #tpu.memory_space<vmem>>, vector<1x128xf32>
      %c2 = arith.constant 2 : index
      %31 = arith.index_cast %arg1 : i32 to index
      %32 = memref.load %arg2[%c2, %31] : memref<16x1xi32, #tpu.memory_space<smem>>
      %c0_i32_18 = arith.constant 0 : i32
      %c127_i32_19 = arith.constant 127 : i32
      %33 = arith.maxsi %c0_i32_18, %32 : i32
      %34 = arith.minsi %c127_i32_19, %33 : i32
      %35 = arith.index_cast %34 : i32 to index
      %c0_20 = arith.constant 0 : index
      %36 = vector.load %arg3[%35, %c0_20] : memref<128x128xf32, #tpu.memory_space<vmem>>, vector<1x128xf32>
      %c3 = arith.constant 3 : index
      %37 = arith.index_cast %arg1 : i32 to index
      %38 = memref.load %arg2[%c3, %37] : memref<16x1xi32, #tpu.memory_space<smem>>
      %c0_i32_21 = arith.constant 0 : i32
      %c127_i32_22 = arith.constant 127 : i32
      %39 = arith.maxsi %c0_i32_21, %38 : i32
      %40 = arith.minsi %c127_i32_22, %39 : i32
      %41 = arith.index_cast %40 : i32 to index
      %c0_23 = arith.constant 0 : index
      %42 = vector.load %arg3[%41, %c0_23] : memref<128x128xf32, #tpu.memory_space<vmem>>, vector<1x128xf32>
      %c4 = arith.constant 4 : index
      %43 = arith.index_cast %arg1 : i32 to index
      %44 = memref.load %arg2[%c4, %43] : memref<16x1xi32, #tpu.memory_space<smem>>
      %c0_i32_24 = arith.constant 0 : i32
      %c127_i32_25 = arith.constant 127 : i32
      %45 = arith.maxsi %c0_i32_24, %44 : i32
      %46 = arith.minsi %c127_i32_25, %45 : i32
      %47 = arith.index_cast %46 : i32 to index
      %c0_26 = arith.constant 0 : index
      %48 = vector.load %arg3[%47, %c0_26] : memref<128x128xf32, #tpu.memory_space<vmem>>, vector<1x128xf32>
      %c5 = arith.constant 5 : index
      %49 = arith.index_cast %arg1 : i32 to index
      %50 = memref.load %arg2[%c5, %49] : memref<16x1xi32, #tpu.memory_space<smem>>
      %c0_i32_27 = arith.constant 0 : i32
      %c127_i32_28 = arith.constant 127 : i32
      %51 = arith.maxsi %c0_i32_27, %50 : i32
      %52 = arith.minsi %c127_i32_28, %51 : i32
      %53 = arith.index_cast %52 : i32 to index
      %c0_29 = arith.constant 0 : index
      %54 = vector.load %arg3[%53, %c0_29] : memref<128x128xf32, #tpu.memory_space<vmem>>, vector<1x128xf32>
      %c6 = arith.constant 6 : index
      %55 = arith.index_cast %arg1 : i32 to index
      %56 = memref.load %arg2[%c6, %55] : memref<16x1xi32, #tpu.memory_space<smem>>
      %c0_i32_30 = arith.constant 0 : i32
      %c127_i32_31 = arith.constant 127 : i32
      %57 = arith.maxsi %c0_i32_30, %56 : i32
      %58 = arith.minsi %c127_i32_31, %57 : i32
      %59 = arith.index_cast %58 : i32 to index
      %c0_32 = arith.constant 0 : index
      %60 = vector.load %arg3[%59, %c0_32] : memref<128x128xf32, #tpu.memory_space<vmem>>, vector<1x128xf32>
      %c7 = arith.constant 7 : index
      %61 = arith.index_cast %arg1 : i32 to index
      %62 = memref.load %arg2[%c7, %61] : memref<16x1xi32, #tpu.memory_space<smem>>
      %c0_i32_33 = arith.constant 0 : i32
      %c127_i32_34 = arith.constant 127 : i32
      %63 = arith.maxsi %c0_i32_33, %62 : i32
      %64 = arith.minsi %c127_i32_34, %63 : i32
      %65 = arith.index_cast %64 : i32 to index
      %c0_35 = arith.constant 0 : index
      %66 = vector.load %arg3[%65, %c0_35] : memref<128x128xf32, #tpu.memory_space<vmem>>, vector<1x128xf32>
      %c8 = arith.constant 8 : index
      %67 = arith.index_cast %arg1 : i32 to index
      %68 = memref.load %arg2[%c8, %67] : memref<16x1xi32, #tpu.memory_space<smem>>
      %c0_i32_36 = arith.constant 0 : i32
      %c127_i32_37 = arith.constant 127 : i32
      %69 = arith.maxsi %c0_i32_36, %68 : i32
      %70 = arith.minsi %c127_i32_37, %69 : i32
      %71 = arith.index_cast %70 : i32 to index
      %c0_38 = arith.constant 0 : index
      %72 = vector.load %arg3[%71, %c0_38] : memref<128x128xf32, #tpu.memory_space<vmem>>, vector<1x128xf32>
      %c9 = arith.constant 9 : index
      %73 = arith.index_cast %arg1 : i32 to index
      %74 = memref.load %arg2[%c9, %73] : memref<16x1xi32, #tpu.memory_space<smem>>
      %c0_i32_39 = arith.constant 0 : i32
      %c127_i32_40 = arith.constant 127 : i32
      %75 = arith.maxsi %c0_i32_39, %74 : i32
      %76 = arith.minsi %c127_i32_40, %75 : i32
      %77 = arith.index_cast %76 : i32 to index
      %c0_41 = arith.constant 0 : index
      %78 = vector.load %arg3[%77, %c0_41] : memref<128x128xf32, #tpu.memory_space<vmem>>, vector<1x128xf32>
      %c10 = arith.constant 10 : index
      %79 = arith.index_cast %arg1 : i32 to index
      %80 = memref.load %arg2[%c10, %79] : memref<16x1xi32, #tpu.memory_space<smem>>
      %c0_i32_42 = arith.constant 0 : i32
      %c127_i32_43 = arith.constant 127 : i32
      %81 = arith.maxsi %c0_i32_42, %80 : i32
      %82 = arith.minsi %c127_i32_43, %81 : i32
      %83 = arith.index_cast %82 : i32 to index
      %c0_44 = arith.constant 0 : index
      %84 = vector.load %arg3[%83, %c0_44] : memref<128x128xf32, #tpu.memory_space<vmem>>, vector<1x128xf32>
      %c11 = arith.constant 11 : index
      %85 = arith.index_cast %arg1 : i32 to index
      %86 = memref.load %arg2[%c11, %85] : memref<16x1xi32, #tpu.memory_space<smem>>
      %c0_i32_45 = arith.constant 0 : i32
      %c127_i32_46 = arith.constant 127 : i32
      %87 = arith.maxsi %c0_i32_45, %86 : i32
      %88 = arith.minsi %c127_i32_46, %87 : i32
      %89 = arith.index_cast %88 : i32 to index
      %c0_47 = arith.constant 0 : index
      %90 = vector.load %arg3[%89, %c0_47] : memref<128x128xf32, #tpu.memory_space<vmem>>, vector<1x128xf32>
      %c12 = arith.constant 12 : index
      %91 = arith.index_cast %arg1 : i32 to index
      %92 = memref.load %arg2[%c12, %91] : memref<16x1xi32, #tpu.memory_space<smem>>
      %c0_i32_48 = arith.constant 0 : i32
      %c127_i32_49 = arith.constant 127 : i32
      %93 = arith.maxsi %c0_i32_48, %92 : i32
      %94 = arith.minsi %c127_i32_49, %93 : i32
      %95 = arith.index_cast %94 : i32 to index
      %c0_50 = arith.constant 0 : index
      %96 = vector.load %arg3[%95, %c0_50] : memref<128x128xf32, #tpu.memory_space<vmem>>, vector<1x128xf32>
      %c13 = arith.constant 13 : index
      %97 = arith.index_cast %arg1 : i32 to index
      %98 = memref.load %arg2[%c13, %97] : memref<16x1xi32, #tpu.memory_space<smem>>
      %c0_i32_51 = arith.constant 0 : i32
      %c127_i32_52 = arith.constant 127 : i32
      %99 = arith.maxsi %c0_i32_51, %98 : i32
      %100 = arith.minsi %c127_i32_52, %99 : i32
      %101 = arith.index_cast %100 : i32 to index
      %c0_53 = arith.constant 0 : index
      %102 = vector.load %arg3[%101, %c0_53] : memref<128x128xf32, #tpu.memory_space<vmem>>, vector<1x128xf32>
      %c14 = arith.constant 14 : index
      %103 = arith.index_cast %arg1 : i32 to index
      %104 = memref.load %arg2[%c14, %103] : memref<16x1xi32, #tpu.memory_space<smem>>
      %c0_i32_54 = arith.constant 0 : i32
      %c127_i32_55 = arith.constant 127 : i32
      %105 = arith.maxsi %c0_i32_54, %104 : i32
      %106 = arith.minsi %c127_i32_55, %105 : i32
      %107 = arith.index_cast %106 : i32 to index
      %c0_56 = arith.constant 0 : index
      %108 = vector.load %arg3[%107, %c0_56] : memref<128x128xf32, #tpu.memory_space<vmem>>, vector<1x128xf32>
      %c15 = arith.constant 15 : index
      %109 = arith.index_cast %arg1 : i32 to index
      %110 = memref.load %arg2[%c15, %109] : memref<16x1xi32, #tpu.memory_space<smem>>
      %c0_i32_57 = arith.constant 0 : i32
      %c127_i32_58 = arith.constant 127 : i32
      %111 = arith.maxsi %c0_i32_57, %110 : i32
      %112 = arith.minsi %c127_i32_58, %111 : i32
      %113 = arith.index_cast %112 : i32 to index
      %c0_59 = arith.constant 0 : index
      %114 = vector.load %arg3[%113, %c0_59] : memref<128x128xf32, #tpu.memory_space<vmem>>, vector<1x128xf32>
      %115 = tpu.concatenate %24, %30, %36, %42, %48, %54, %60, %66, %72, %78, %84, %90, %96, %102, %108, %114 in 0 : vector<1x128xf32>, vector<1x128xf32>, vector<1x128xf32>, vector<1x128xf32>, vector<1x128xf32>, vector<1x128xf32>, vector<1x128xf32>, vector<1x128xf32>, vector<1x128xf32>, vector<1x128xf32>, vector<1x128xf32>, vector<1x128xf32>, vector<1x128xf32>, vector<1x128xf32>, vector<1x128xf32>, vector<1x128xf32> -> vector<16x128xf32>
      %116 = arith.truncf %115 : vector<16x128xf32> to vector<16x128xbf16>
      %c0_60 = arith.constant 0 : index
      %c0_61 = arith.constant 0 : index
      %c0_62 = arith.constant 0 : index
      %117 = vector.load %arg14[%c0_60, %c0_61, %c0_62] : memref<2x16x128xf32, #tpu.memory_space<vmem>>, vector<1x16x128xf32>
      %118 = vector.shape_cast %117 : vector<1x16x128xf32> to vector<16x128xf32>
      %119 = arith.truncf %118 : vector<16x128xf32> to vector<16x128xbf16>
      %120 = tpu.concatenate %116, %119 in 1 : vector<16x128xbf16>, vector<16x128xbf16> -> vector<16x256xbf16>
      %c0_63 = arith.constant 0 : index
      %c0_64 = arith.constant 0 : index
      %121 = vector.load %arg5[%c0_63, %c0_64] : memref<256x128xbf16, #tpu.memory_space<vmem>>, vector<256x128xbf16>
      %cst_65 = arith.constant dense<0.000000e+00> : vector<16x128xf32>
      %122 = tpu.matmul %120, %121, %cst_65 {dimension_numbers = #tpu.dot_dimension_numbers<[1], [0], [0], [1], [0, 0, 1, 1], [], []>} : vector<16x256xbf16>, vector<256x128xbf16>, vector<16x128xf32> -> vector<16x128xf32>
      %c0_66 = arith.constant 0 : index
      %c0_67 = arith.constant 0 : index
      %123 = vector.load %arg6[%c0_66, %c0_67] : memref<1x128xf32, #tpu.memory_space<vmem>>, vector<1x128xf32>
      %124 = vector.broadcast %123 : vector<1x128xf32> to vector<16x128xf32>
      %125 = arith.addf %122, %124 : vector<16x128xf32>
      %126 = math.tanh %125 : vector<16x128xf32>
      %c0_68 = arith.constant 0 : index
      %c0_69 = arith.constant 0 : index
      %c0_70 = arith.constant 0 : index
      %127 = vector.load %arg14[%c0_68, %c0_69, %c0_70] : memref<2x16x128xf32, #tpu.memory_space<vmem>>, vector<1x16x128xf32>
      %128 = vector.shape_cast %127 : vector<1x16x128xf32> to vector<16x128xf32>
      %129 = vector.shape_cast %126 : vector<16x128xf32> to vector<1x16x128xf32>
      tpu.vector_store %arg14[%c0_68, %c0_69, %c0_70], %129 {strides = array<i32>} : memref<2x16x128xf32, #tpu.memory_space<vmem>>, vector<1x16x128xf32>,
      %130 = arith.truncf %126 : vector<16x128xf32> to vector<16x128xbf16>
      %c1_71 = arith.constant 1 : index
      %c0_72 = arith.constant 0 : index
      %c0_73 = arith.constant 0 : index
      %131 = vector.load %arg14[%c1_71, %c0_72, %c0_73] : memref<2x16x128xf32, #tpu.memory_space<vmem>>, vector<1x16x128xf32>
      %132 = vector.shape_cast %131 : vector<1x16x128xf32> to vector<16x128xf32>
      %133 = arith.truncf %132 : vector<16x128xf32> to vector<16x128xbf16>
      %134 = tpu.concatenate %130, %133 in 1 : vector<16x128xbf16>, vector<16x128xbf16> -> vector<16x256xbf16>
      %c0_74 = arith.constant 0 : index
      %c0_75 = arith.constant 0 : index
      %135 = vector.load %arg7[%c0_74, %c0_75] : memref<256x128xbf16, #tpu.memory_space<vmem>>, vector<256x128xbf16>
      %cst_76 = arith.constant dense<0.000000e+00> : vector<16x128xf32>
      %136 = tpu.matmul %134, %135, %cst_76 {dimension_numbers = #tpu.dot_dimension_numbers<[1], [0], [0], [1], [0, 0, 1, 1], [], []>} : vector<16x256xbf16>, vector<256x128xbf16>, vector<16x128xf32> -> vector<16x128xf32>
      %c0_77 = arith.constant 0 : index
      %c0_78 = arith.constant 0 : index
      %137 = vector.load %arg8[%c0_77, %c0_78] : memref<1x128xf32, #tpu.memory_space<vmem>>, vector<1x128xf32>
      %138 = vector.broadcast %137 : vector<1x128xf32> to vector<16x128xf32>
      %139 = arith.addf %136, %138 : vector<16x128xf32>
      %140 = math.tanh %139 : vector<16x128xf32>
      %c1_79 = arith.constant 1 : index
      %c0_80 = arith.constant 0 : index
      %c0_81 = arith.constant 0 : index
      %141 = vector.load %arg14[%c1_79, %c0_80, %c0_81] : memref<2x16x128xf32, #tpu.memory_space<vmem>>, vector<1x16x128xf32>
      %142 = vector.shape_cast %141 : vector<1x16x128xf32> to vector<16x128xf32>
      %143 = vector.shape_cast %140 : vector<16x128xf32> to vector<1x16x128xf32>
      tpu.vector_store %arg14[%c1_79, %c0_80, %c0_81], %143 {strides = array<i32>} : memref<2x16x128xf32, #tpu.memory_space<vmem>>, vector<1x16x128xf32>,
      %144 = arith.truncf %140 : vector<16x128xf32> to vector<16x128xbf16>
      %145 = arith.index_cast %arg1 : i32 to index
      %c0_82 = arith.constant 0 : index
      %c0_83 = arith.constant 0 : index
      %146 = vector.load %arg13[%145, %c0_82, %c0_83] : memref<1x16x128xbf16, #tpu.memory_space<vmem>>, vector<1x16x128xbf16>
      %147 = vector.shape_cast %146 : vector<1x16x128xbf16> to vector<16x128xbf16>
      %148 = vector.shape_cast %144 : vector<16x128xbf16> to vector<1x16x128xbf16>
      tpu.vector_store %arg13[%145, %c0_82, %c0_83], %148 {strides = array<i32>} : memref<1x16x128xbf16, #tpu.memory_space<vmem>>, vector<1x16x128xbf16>,
      %c0_i32_84 = arith.constant 0 : i32
      %149 = arith.cmpi eq, %arg1, %c0_i32_84 : i32
      %150 = arith.extui %149 : i1 to i32
      %c0_i32_85 = arith.constant 0 : i32
      %151 = arith.cmpi ne, %150, %c0_i32_85 : i32
      scf.if %151 {
        %c0_86 = arith.constant 0 : index
        %c0_87 = arith.constant 0 : index
        %c0_88 = arith.constant 0 : index
        %152 = vector.load %arg14[%c0_86, %c0_87, %c0_88] : memref<2x16x128xf32, #tpu.memory_space<vmem>>, vector<2x16x128xf32>
        %c0_89 = arith.constant 0 : index
        %c0_90 = arith.constant 0 : index
        %c0_91 = arith.constant 0 : index
        %153 = vector.load %arg12[%c0_89, %c0_90, %c0_91] : memref<2x16x128xf32, #tpu.memory_space<vmem>>, vector<2x16x128xf32>
        tpu.vector_store %arg12[%c0_89, %c0_90, %c0_91], %152 {strides = array<i32>} : memref<2x16x128xf32, #tpu.memory_space<vmem>>, vector<2x16x128xf32>,
      } else {
      }
    } else {
    }
    %8 = arith.index_cast %arg1 : i32 to index
    %c0 = arith.constant 0 : index
    %c0_4 = arith.constant 0 : index
    %9 = vector.load %arg13[%8, %c0, %c0_4] : memref<1x16x128xbf16, #tpu.memory_space<vmem>>, vector<1x16x128xbf16>
    %10 = vector.shape_cast %9 : vector<1x16x128xbf16> to vector<16x128xbf16>
    %c0_5 = arith.constant 0 : index
    %c0_6 = arith.constant 0 : index
    %11 = vector.load %arg9[%c0_5, %c0_6] : memref<128x128xbf16, #tpu.memory_space<vmem>>, vector<128x128xbf16>
    %cst = arith.constant dense<0.000000e+00> : vector<16x128xf32>
    %12 = tpu.matmul %10, %11, %cst {dimension_numbers = #tpu.dot_dimension_numbers<[1], [0], [0], [1], [0, 0, 1, 1], [], []>} : vector<16x128xbf16>, vector<128x128xbf16>, vector<16x128xf32> -> vector<16x128xf32>
    %c0_7 = arith.constant 0 : index
    %c0_8 = arith.constant 0 : index
    %13 = vector.load %arg10[%c0_7, %c0_8] : memref<1x128xf32, #tpu.memory_space<vmem>>, vector<1x128xf32>
    %14 = vector.broadcast %13 : vector<1x128xf32> to vector<16x128xf32>
    %15 = arith.addf %12, %14 : vector<16x128xf32>
    %c0_9 = arith.constant 0 : index
    %c0_10 = arith.constant 0 : index
    %c0_11 = arith.constant 0 : index
    %16 = vector.load %arg11[%c0_9, %c0_10, %c0_11] : memref<1x16x128xf32, #tpu.memory_space<vmem>>, vector<1x16x128xf32>
    %17 = vector.shape_cast %16 : vector<1x16x128xf32> to vector<16x128xf32>
    %18 = vector.shape_cast %15 : vector<16x128xf32> to vector<1x16x128xf32>
    tpu.vector_store %arg11[%c0_9, %c0_10, %c0_11], %18 {strides = array<i32>} : memref<1x16x128xf32, #tpu.memory_space<vmem>>, vector<1x16x128xf32>,
    return
  }
  func.func @transform_0(%arg0: i32, %arg1: i32) -> (i32, i32) {
    %c0_i32 = arith.constant 0 : i32
    %c0_i32_0 = arith.constant 0 : i32
    %c0_i32_1 = arith.constant 0 : i32
    return %c0_i32, %c0_i32_0 : i32, i32
  }
  func.func @transform_1(%arg0: i32, %arg1: i32) -> (i32, i32) {
    %c0_i32 = arith.constant 0 : i32
    %c0_i32_0 = arith.constant 0 : i32
    %c0_i32_1 = arith.constant 0 : i32
    return %c0_i32, %c0_i32_0 : i32, i32
  }
  func.func @transform_2(%arg0: i32, %arg1: i32) -> (i32, i32, i32) {
    %c0_i32 = arith.constant 0 : i32
    %c0_i32_0 = arith.constant 0 : i32
    %c0_i32_1 = arith.constant 0 : i32
    %c0_i32_2 = arith.constant 0 : i32
    return %c0_i32, %c0_i32_0, %c0_i32_1 : i32, i32, i32
  }
  func.func @transform_3(%arg0: i32, %arg1: i32) -> (i32, i32) {
    %c0_i32 = arith.constant 0 : i32
    %c0_i32_0 = arith.constant 0 : i32
    %c0_i32_1 = arith.constant 0 : i32
    return %c0_i32, %c0_i32_0 : i32, i32
  }
  func.func @transform_4(%arg0: i32, %arg1: i32) -> (i32, i32) {
    %c0_i32 = arith.constant 0 : i32
    %c0_i32_0 = arith.constant 0 : i32
    %c0_i32_1 = arith.constant 0 : i32
    return %c0_i32, %c0_i32_0 : i32, i32
  }
  func.func @transform_5(%arg0: i32, %arg1: i32) -> (i32, i32) {
    %c0_i32 = arith.constant 0 : i32
    %c0_i32_0 = arith.constant 0 : i32
    %c0_i32_1 = arith.constant 0 : i32
    return %c0_i32, %c0_i32_0 : i32, i32
  }
  func.func @transform_6(%arg0: i32, %arg1: i32) -> (i32, i32) {
    %c0_i32 = arith.constant 0 : i32
    %c0_i32_0 = arith.constant 0 : i32
    %c0_i32_1 = arith.constant 0 : i32
    return %c0_i32, %c0_i32_0 : i32, i32
  }
  func.func @transform_7(%arg0: i32, %arg1: i32) -> (i32, i32) {
    %c0_i32 = arith.constant 0 : i32
    %c0_i32_0 = arith.constant 0 : i32
    return %c0_i32, %arg0 : i32, i32
  }
  func.func @transform_8(%arg0: i32, %arg1: i32) -> (i32, i32) {
    %c0_i32 = arith.constant 0 : i32
    %c0_i32_0 = arith.constant 0 : i32
    return %c0_i32, %arg0 : i32, i32
  }
  func.func @transform_9(%arg0: i32, %arg1: i32) -> (i32, i32, i32) {
    %c0_i32 = arith.constant 0 : i32
    %c0_i32_0 = arith.constant 0 : i32
    return %arg1, %c0_i32, %arg0 : i32, i32, i32
  }
  func.func @transform_10(%arg0: i32, %arg1: i32) -> (i32, i32, i32) {
    %c0_i32 = arith.constant 0 : i32
    %c0_i32_0 = arith.constant 0 : i32
    %c0_i32_1 = arith.constant 0 : i32
    %c0_i32_2 = arith.constant 0 : i32
    return %c0_i32, %c0_i32_0, %c0_i32_1 : i32, i32, i32
  }
}

</mosaic_0001>

<bundles_post_ra>
// kernel: _lambda_.1
= control target key start
LH: loop header
LB: loop body
LE: loop exit
PB: predicated region body
PF: predicated region fallthrough
CT: control target
= control target key end

     0   :  { %16 = vsyncpa [#allocation6], 0  ;;  %s1542_s0 = inlined_call_operand.vmem [shape: s32[16,1], index: 0, kind: input, shape index: {}]   ;;  %s1543_s1 = inlined_call_operand.hbm [shape: f32[128,128], index: 1, kind: input, shape index: {}]   ;;  %s1544_s2 = inlined_call_operand.vmem [shape: f32[2,16,128], index: 2, kind: input, shape index: {}]   ;;  %s1545_s3 = inlined_call_operand.hbm [shape: bf16[256,128], index: 3, kind: input, shape index: {}]   ;;  %s1546_s4 = inlined_call_operand.vmem [shape: f32[1,128], index: 4, kind: input, shape index: {}]   ;;  %s1547_s5 = inlined_call_operand.hbm [shape: bf16[256,128], index: 5, kind: input, shape index: {}]   ;;  %s1548_s6 = inlined_call_operand.vmem [shape: f32[1,128], index: 6, kind: input, shape index: {}]   ;;  %s1549_s7 = inlined_call_operand.vmem [shape: bf16[128,128], index: 7, kind: input, shape index: {}]   ;;  %s1550_s8 = inlined_call_operand.vmem [shape: f32[1,128], index: 8, kind: input, shape index: {}]   ;;  %s1551_s9 = inlined_call_operand.vmem [shape: f32[1,16,128], index: 9, kind: output, shape index: {0}]   ;;  %s1552_s10 = inlined_call_operand.vmem [shape: f32[2,16,128], index: 10, kind: output, shape index: {1}]  }
   0x1   :  { %17 = vsyncpa [#allocation5], 0 }
   0x2   :  { %18 = vsyncpa [#allocation9], 0  ;;  %s1237_s13 = smov [#allocation8]   ;;  %s24_s17 = sshll.u32 %s1542_s0, 4  ;;  %s25_s17 = int_to_ptr.vmem [resolvable:$true] %s24_s17 }
   0x3   :  { %s50_s14 = sshll.u32 %s1237_s13, 4  ;;  %s1153_s20 = scalar_lea.hbm %s1545_s3, 2048  ;;  %s51_s14 = int_to_ptr.vmem [resolvable:$true] %s50_s14 }
   0x4   :  { %p1154_p0 = scmp.ne.s32.totalorder %s1545_s3, %s1153_s20  ;;  %p1157_p1 = scmp.lt.u32.totalorder %s1153_s20, %s1545_s3 }
   0x6   :  { %p1159_p2 = pnand %p1157_p1, %p1154_p0 }
   0x8   :  { %1162 = shalt.err (!%p1159_p2)
}
   0x9   :  { %s1163_s25 = scalar_lea.vmem %s51_s14, 2048  ;;  %p1168_p4 = scmp.lt.s32.totalorder %s51_s14, %s51_s14 }
   0xa   :  { %p1164_p3 = scmp.ne.s32.totalorder %s51_s14, %s1163_s25  ;;  %p1169_p5 = scmp.lt.s32.totalorder %s1163_s25, %s1163_s25 }
   0xc   :  { %p1170_p6 = por %p1169_p5, %p1168_p4 }
   0xe   :  { %p1171_p7 = pnand %p1170_p6, %p1164_p3 }
  0x10   :  { %1174 = shalt.err (!%p1171_p7)
}
  0x11   :  { %s1238_s0 = smov 64   ;;  %s1239_s26 = smov 4  }
  0x12   :  { %56 = dma.hbm_to_vmem [thread:$0]  %s1545_s3, 2048, %s51_s14, [#allocation9], %s1238_s0, %s1238_s0, %s1239_s26  }
  0x13   :  { %s1175_s29 = scalar_lea.vmem %s25_s17, 256  ;;  %p1180_p9 = scmp.lt.s32.totalorder %s25_s17, %s25_s17 }
  0x14   :  { %p1176_p8 = scmp.ne.s32.totalorder %s25_s17, %s1175_s29  ;;  %p1181_p10 = scmp.lt.s32.totalorder %s1175_s29, %s1175_s29 }
  0x16   :  { %p1182_p11 = por %p1181_p10, %p1180_p9 }
  0x18   :  { %p1183_p12 = pnand %p1182_p11, %p1176_p8 }
  0x1a   :  { %1186 = shalt.err (!%p1183_p12)
}
  0x1b   :  { %s1240_s30 = smov [#allocation4]   ;;  %s1241_s11 = smov 128  }
  0x1c   :  { %s1242_s12 = smov 8   ;;  %s1243_s13 = smov [#allocation7]  }
  0x1d   :  { %30 = dma.vmem_to_smem %s25_s17, 256, %s1240_s30, [#allocation6], %s1241_s11, %s1241_s11, %s1242_s12  }
  0x1e   :  { %s36_s15 = sshll.u32 %s1243_s13, 4  ;;  %s1244_s16 = smov [#allocation10]   ;;  %s37_s15 = int_to_ptr.vmem [resolvable:$true] %s36_s15 }
  0x1f   :  { %s64_s18 = sshll.u32 %s1244_s16, 4  ;;  %s1187_s19 = scalar_lea.hbm %s1543_s1, 2048  ;;  %s1320_s18 = int_to_ptr.vmem [resolvable:$true] %s64_s18 }
  0x20   :  { %p1188_p13 = scmp.ne.s32.totalorder %s1543_s1, %s1187_s19  ;;  %p1191_p0 = scmp.lt.u32.totalorder %s1187_s19, %s1543_s1 }
  0x22   :  { %p1193_p1 = pnand %p1191_p0, %p1188_p13 }
  0x24   :  { %1196 = shalt.err (!%p1193_p1)
}
  0x25   :  { %s1197_s17 = scalar_lea.vmem %s37_s15, 2048  ;;  %p1202_p3 = scmp.lt.s32.totalorder %s37_s15, %s37_s15 }
  0x26   :  { %p1198_p2 = scmp.ne.s32.totalorder %s37_s15, %s1197_s17  ;;  %p1203_p4 = scmp.lt.s32.totalorder %s1197_s17, %s1197_s17 }
  0x28   :  { %p1204_p5 = por %p1203_p4, %p1202_p3 }
  0x2a   :  { %p1205_p6 = pnand %p1204_p5, %p1198_p2 }
  0x2c   :  { %1208 = shalt.err (!%p1205_p6)
}
  0x2d   :  { %42 = dma.hbm_to_vmem [thread:$0]  %s1543_s1, 2048, %s37_s15, [#allocation5], %s1241_s11, %s1241_s11, %s1242_s12  }
  0x2e   :  { %s1209_s29 = scalar_lea.hbm %s1547_s5, 2048 }
  0x2f   :  { %p1210_p7 = scmp.ne.s32.totalorder %s1547_s5, %s1209_s29  ;;  %p1213_p8 = scmp.lt.u32.totalorder %s1209_s29, %s1547_s5 }
  0x31   :  { %p1215_p9 = pnand %p1213_p8, %p1210_p7 }
  0x33   :  { %1218 = shalt.err (!%p1215_p9)
}
  0x34   :  { %s1219_s14 = scalar_lea.vmem %s1320_s18, 2048  ;;  %p1224_p11 = scmp.lt.s32.totalorder %s1320_s18, %s1320_s18 }
  0x35   :  { %p1220_p10 = scmp.ne.s32.totalorder %s1320_s18, %s1219_s14  ;;  %p1225_p12 = scmp.lt.s32.totalorder %s1219_s14, %s1219_s14 }
  0x37   :  { %p1226_p13 = por %p1225_p12, %p1224_p11 }
  0x39   :  { %p1227_p0 = pnand %p1226_p13, %p1220_p10 }
  0x3b   :  { %1230 = shalt.err (!%p1227_p0)
}
  0x3c   :  { %70 = dma.hbm_to_vmem [thread:$0]  %s1547_s5, 2048, %s1320_s18, [#allocation9], %s1238_s0, %s1238_s0, %s1239_s26  }
  0x3d   :  { %1231 = dma.done.wait [#allocation6], 256  }
  0x3e   :  { %1232 = vsyncadd [#allocation6], 4294967040 }
  0x3f   :  { %1233 = dma.done.wait [#allocation5], 2048  }
  0x40   :  { %1234 = vsyncadd [#allocation5], 4294965248 }
  0x41   :  { %1235 = dma.done.wait [#allocation9], 4096  }
  0x42   :  { %1236 = vsyncadd [#allocation9], 4294963200 }
  0x43   :  { %89 = sfence }
  0x44   :  { %v1105_v0 = vld [vmem:[#allocation8 + $0x40] sm:$0xff]   ;;  %v1107_v2 = vld [vmem:[#allocation8 + $0x48] sm:$0xff]   ;;  %v1109_v4 = vld [vmem:[#allocation8 + $0x50] sm:$0xff]   ;;  %s1360_s15 = sld [smem:[#allocation4]]  ;;  %vm307_vm0 = vcmask 1040384   ;;  %vm309_vm1 = vcmask 1041408  }
  0x45   :  { %v1106_v1 = vld [vmem:[#allocation8] sm:$0xff]   ;;  %1022 = vmatprep.subr.bf16.mxu0 %v1105_v0  ;;  %v1108_v3 = vld [vmem:[#allocation8 + $0x8] sm:$0xff]   ;;  %v1110_v5 = vld [vmem:[#allocation8 + $0x10] sm:$0xff]   ;;  %s1362_s18 = sld [smem:[#allocation4 + $0x80]]  ;;  %vm311_vm2 = vcmask 1042432   ;;  %vm313_vm3 = vcmask 1043456  }
  0x46   :  { %1023 = vmatpush3.bf16.msra.mxu0 %v1106_v1  ;;  %v1111_v6 = vld [vmem:[#allocation8 + $0x58] sm:$0xff]   ;;  %v1113_v8 = vld [vmem:[#allocation8 + $0x60] sm:$0xff]   ;;  %v1115_v10 = vld [vmem:[#allocation8 + $0x68] sm:$0xff]   ;;  %s1364_s19 = sld [smem:[#allocation4 + $0x100]]  ;;  %vm315_vm4 = vcmask 1044480   ;;  %vm317_vm5 = vcmask 1045504  }
  0x47   :  { %1024 = vmatprep.subr.bf16.mxu0 %v1107_v2  ;;  %v1112_v7 = vld [vmem:[#allocation8 + $0x18] sm:$0xff]   ;;  %v1114_v9 = vld [vmem:[#allocation8 + $0x20] sm:$0xff]   ;;  %v98_v12 = vld [vmem:[%s1544_s2 + $0x8] sm:$0xff]  ;;  %s1366_s20 = sld [smem:[#allocation4 + $0x180]]  ;;  %vm319_vm6 = vcmask 1046528   ;;  %vm1246_vm7 = vmmov 0  }
  0x48   :  { %v97_v11 = vld [vmem:[%s1544_s2] sm:$0xff]  ;;  %v1116_v14 = vld [vmem:[#allocation8 + $0x28] sm:$0xff]   ;;  %v1117_v15 = vld [vmem:[#allocation8 + $0x70] sm:$0xff]   ;;  %s1368_s21 = sld [smem:[#allocation4 + $0x200]] }
  0x49   :  { %v331_v13 = vpack.c.bf16 %v98_v12, %v97_v11  ;;  %v1121_v16 = vld [vmem:[#allocation10 + $0x40] sm:$0xff]   ;;  %s1370_s22 = sld [smem:[#allocation4 + $0x280]]  ;;  %v1118_v18 = vld [vmem:[#allocation8 + $0x30] sm:$0xff]   ;;  %v1119_v19 = vld [vmem:[#allocation8 + $0x78] sm:$0xff]  }
  0x4a   :  { %1025 = vmatpush3.bf16.msra.mxu0 %v1108_v3  ;;  %v1122_v17 = vld [vmem:[#allocation10] sm:$0xff]   ;;  %s1372_s23 = sld [smem:[#allocation4 + $0x300]]  ;;  %1044 = vmatprep.subr.bf16.mxu1 %v1121_v16  ;;  %p109_p1 = scmp.gt.s32.totalorder %s1360_s15, 0  ;;  %v1123_v20 = vld [vmem:[#allocation10 + $0x48] sm:$0xff]   ;;  %v1125_v22 = vld [vmem:[#allocation10 + $0x50] sm:$0xff]  }
  0x4b   :  { %1026 = vmatprep.subr.bf16.mxu0 %v1109_v4  ;;  %499 = vmatprep.mubr.bf16.mxu0 %v331_v13  ;;  %s1374_s17 = sld [smem:[#allocation4 + $0x380]]  ;;  %p852_p2 = scmp.lt.s32.totalorder %s1360_s15, 127  ;;  %v1124_v21 = vld [vmem:[#allocation10 + $0x8] sm:$0xff]   ;;  %v1126_v23 = vld [vmem:[#allocation10 + $0x10] sm:$0xff]   ;;  %v1120_v24 = vld [vmem:[#allocation8 + $0x38] sm:$0xff]  }
  0x4c   :  { %s1376_s24 = sld [smem:[#allocation4 + $0x400]]  ;;  %1045 = vmatpush3.bf16.msra.mxu1 %v1122_v17  ;;  %p119_p3 = scmp.gt.s32.totalorder %s1362_s18, 0  ;;  %v1132_v11 = vld [vmem:[#allocation10 + $0x28] sm:$0xff]   ;;  %v1133_v12 = vld [vmem:[#allocation10 + $0x70] sm:$0xff]   ;;  %v100_v17 = vld [vmem:[%s1544_s2 + $0x18] sm:$0xff] }
  0x4d   :  { %s110_s25 = scalar_select %p109_p1, %s1360_s15, 0  ;;  %1046 = vmatprep.subr.bf16.mxu1 %v1123_v20  ;;  %v1134_v13 = vld [vmem:[#allocation10 + $0x30] sm:$0xff]   ;;  %v1245_v20 = vmov 0.0  }
  0x4e   :  { %1027 = vmatpush3.bf16.msra.mxu0 %v1110_v5  ;;  %s1382_s27 = sld [smem:[#allocation4 + $0x480]]  ;;  %p858_p4 = scmp.lt.s32.totalorder %s1362_s18, 127  ;;  %v99_v16 = vld [vmem:[%s1544_s2 + $0x10] sm:$0xff] }
  0x4f   :  { %1028 = vmatprep.subr.bf16.mxu0 %v1111_v6  ;;  %s120_s28 = scalar_select %p119_p3, %s1362_s18, 0  ;;  %v1127_v6 = vld [vmem:[#allocation10 + $0x58] sm:$0xff]  }
  0x50   :  { %1047 = vmatpush3.bf16.msra.mxu1 %v1124_v21  ;;  %s1554_s25 = smov (!%p852_p2, %s110_s25), 127  ;;  %p129_p5 = scmp.gt.s32.totalorder %s1364_s19, 0  ;;  %v1138_v21 = vld [vmem:[%s1549_s7 + $0x8] sm:$0xff]  }
  0x51   :  { %1048 = vmatprep.subr.bf16.mxu1 %v1125_v22  ;;  %p864_p6 = scmp.lt.s32.totalorder %s1364_s19, 127  ;;  %s1392_s29 = sld [smem:[#allocation4 + $0x500]]  ;;  %v1139_v22 = vld [vmem:[%s1549_s7 + $0x10] sm:$0xff]  }
  0x52   :  { %1029 = vmatpush3.bf16.msra.mxu0 %v1112_v7  ;;  %s1556_s19 = smov (!%p129_p5, %s1364_s19), 0  ;;  %p139_p7 = scmp.gt.s32.totalorder %s1366_s20, 0  ;;  %v1128_v7 = vld [vmem:[#allocation10 + $0x18] sm:$0xff]  }
  0x53   :  { %1030 = vmatprep.subr.bf16.mxu0 %v1113_v8  ;;  %s1396_s30 = sld [smem:[#allocation4 + $0x580]]  ;;  %s1558_s28 = smov (!%p858_p4, %s120_s28), 127  ;;  %v1129_v8 = vld [vmem:[#allocation10 + $0x60] sm:$0xff]  }
  0x54   :  { %1049 = vmatpush3.bf16.msra.mxu1 %v1126_v23  ;;  %s1560_s19 = smov (!%p864_p6, %s1556_s19), 127  ;;  %p870_p8 = scmp.lt.s32.totalorder %s1366_s20, 127 }
  0x55   :  { %p149_p9 = scmp.gt.s32.totalorder %s1368_s21, 0  ;;  %s1562_s20 = smov (!%p139_p7, %s1366_s20), 0  ;;  %1050 = vmatprep.subr.bf16.mxu1 %v1127_v6 }
  0x56   :  { %1031 = vmatpush3.bf16.msra.mxu0 %v1114_v9  ;;  %p876_p10 = scmp.lt.s32.totalorder %s1368_s21, 127  ;;  %p159_p11 = scmp.gt.s32.totalorder %s1370_s22, 0  ;;  %v1130_v9 = vld [vmem:[#allocation10 + $0x20] sm:$0xff]  }
  0x57   :  { %1032 = vmatprep.subr.bf16.mxu0 %v1115_v10  ;;  %s150_s13 = scalar_select %p149_p9, %s1368_s21, 0  ;;  %v1131_v10 = vld [vmem:[#allocation10 + $0x68] sm:$0xff]  }
  0x58   :  { %s1564_s20 = smov (!%p870_p8, %s1562_s20), 127  ;;  %p882_p12 = scmp.lt.s32.totalorder %s1370_s22, 127  ;;  %1051 = vmatpush3.bf16.msra.mxu1 %v1128_v7 }
  0x59   :  { %s1566_s13 = smov (!%p876_p10, %s150_s13), 127  ;;  %p169_p13 = scmp.gt.s32.totalorder %s1372_s23, 0  ;;  %1052 = vmatprep.subr.bf16.mxu1 %v1129_v8 }
  0x5a   :  { %1033 = vmatpush3.bf16.msra.mxu0 %v1116_v14  ;;  %s1568_s22 = smov (!%p159_p11, %s1370_s22), 0  ;;  %p888_p0 = scmp.lt.s32.totalorder %s1372_s23, 127  ;;  %v1135_v14 = vld [vmem:[#allocation10 + $0x78] sm:$0xff]  }
  0x5b   :  { %1034 = vmatprep.subr.bf16.mxu0 %v1117_v15  ;;  %s170_s16 = scalar_select %p169_p13, %s1372_s23, 0  ;;  %v1136_v15 = vld [vmem:[#allocation10 + $0x38] sm:$0xff]  }
  0x5c   :  { %p179_p1 = scmp.gt.s32.totalorder %s1374_s17, 0  ;;  %s1570_s22 = smov (!%p882_p12, %s1568_s22), 127  ;;  %1053 = vmatpush3.bf16.msra.mxu1 %v1130_v9 }
  0x5d   :  { %s1572_s16 = smov (!%p888_p0, %s170_s16), 127  ;;  %p189_p2 = scmp.gt.s32.totalorder %s1376_s24, 0  ;;  %1054 = vmatprep.subr.bf16.mxu1 %v1131_v10 }
  0x5e   :  { %1035 = vmatpush3.bf16.msra.mxu0 %v1118_v18  ;;  %s180_s3 = scalar_select %p179_p1, %s1374_s17, 0  ;;  %v516_v18 = vpack.c.bf16 %v100_v17, %v99_v16 }
  0x5f   :  { %1036 = vmatprep.subr.bf16.mxu0 %v1119_v19  ;;  %s190_s14 = scalar_select %p189_p2, %s1376_s24, 0  ;;  %v1137_v19 = vld [vmem:[%s1549_s7] sm:$0xff]  }
  0x60   :  { %p900_p3 = scmp.lt.s32.totalorder %s1376_s24, 127  ;;  %p199_p4 = scmp.gt.s32.totalorder %s1382_s27, 0  ;;  %1055 = vmatpush3.bf16.msra.mxu1 %v1132_v11  ;;  %684 = vmatprep.mubr.bf16.mxu1 %v516_v18 }
  0x61   :  { %p906_p5 = scmp.lt.s32.totalorder %s1382_s27, 127  ;;  %p894_p6 = scmp.lt.s32.totalorder %s1374_s17, 127  ;;  %1056 = vmatprep.subr.bf16.mxu1 %v1133_v12 }
  0x62   :  { %1037 = vmatpush3.bf16.msra.mxu0 %v1120_v24  ;;  %s1574_s14 = smov (!%p900_p3, %s190_s14), 127  ;;  %s1576_s27 = smov (!%p199_p4, %s1382_s27), 0  ;;  %v947_v24 = vld [vmem:[%s1546_s4] ss:$0 sm:$0xff] }
  0x63   :  { %p209_p7 = scmp.gt.s32.totalorder %s1392_s29, 0  ;;  %s1578_s27 = smov (!%p906_p5, %s1576_s27), 127  ;;  %1075 = vmatprep.subr.bf16.mxu0 %v1245_v20 }
  0x64   :  { %p912_p8 = scmp.lt.s32.totalorder %s1392_s29, 127  ;;  %p219_p9 = scmp.gt.s32.totalorder %s1396_s30, 0  ;;  %1057 = vmatpush3.bf16.msra.mxu1 %v1134_v13 }
  0x65   :  { %s210_s1 = scalar_select %p209_p7, %s1392_s29, 0  ;;  %1058 = vmatprep.subr.bf16.mxu1 %v1135_v14 }
  0x66   :  { %p918_p10 = scmp.lt.s32.totalorder %s1396_s30, 127  ;;  %s123_s11 = scalar_lea.vmem [#allocation7], %s1558_s28 }
  0x67   :  { %s1580_s1 = smov (!%p912_p8, %s210_s1), 127  ;;  %v124_v25 = vld [vmem:[%s123_s11] sm:$0x1]  ;;  %s1582_s30 = smov (!%p219_p9, %s1396_s30), 0 }
  0x68   :  { %s133_s5 = scalar_lea.vmem [#allocation7], %s1560_s19  ;;  %s1440_s0 = sld [smem:[#allocation4 + $0x600]]  ;;  %v266_v28 = vrot.slane %v124_v25, 7  ;;  %1059 = vmatpush3.bf16.msra.mxu1 %v1136_v15 }
  0x69   :  { %v134_v26 = vld [vmem:[%s133_s5] sm:$0x1]  ;;  %s203_s26 = scalar_lea.vmem [#allocation7], %s1578_s27  ;;  %s1584_s30 = smov (!%p918_p10, %s1582_s30), 127 }
  0x6a   :  { %v204_v27 = vld [vmem:[%s203_s26] sm:$0x1]  ;;  %s1442_s12 = sld [smem:[#allocation4 + $0x680]]  ;;  %s113_s15 = scalar_lea.vmem [#allocation7], %s1554_s25  ;;  %v269_v30 = vrot.slane %v134_v26, 6 }
  0x6b   :  { %v114_v29 = vld [vmem:[%s113_s15] sm:$0x1]  ;;  %s1586_s3 = smov (!%p894_p6, %s180_s3), 127  ;;  %s213_s18 = scalar_lea.vmem [#allocation7], %s1580_s1  ;;  %v287_v32 = vrot.slane %v204_v27, 7 }
  0x6c   :  { %v214_v31 = vld [vmem:[%s213_s18] sm:$0x1]  ;;  %s1449_s19 = sld [smem:[#allocation4 + $0x700]]  ;;  %s143_s21 = scalar_lea.vmem [#allocation7], %s1564_s20  ;;  %v308_v35 = vsel %vm307_vm0, %v114_v29, %v266_v28 }
  0x6d   :  { %v144_v33 = vld [vmem:[%s143_s21] sm:$0x1]  ;;  %s193_s23 = scalar_lea.vmem [#allocation7], %s1574_s14  ;;  %s223_s17 = scalar_lea.vmem [#allocation7], %s1584_s30  ;;  %v290_v37 = vrot.slane %v214_v31, 6  ;;  %v310_v41 = vsel %vm309_vm1, %v308_v35, %v269_v30  ;;  %v1140_v35 = vld [vmem:[%s1549_s7 + $0x18] sm:$0xff]  }
  0x6e   :  { %v194_v34 = vld [vmem:[%s193_s23] sm:$0x1]  ;;  %p229_p11 = scmp.gt.s32.totalorder %s1440_s0, 0  ;;  %p924_p12 = scmp.lt.s32.totalorder %s1440_s0, 127  ;;  %v272_v39 = vrot.slane %v144_v33, 5 }
  0x6f   :  { %v224_v36 = vld [vmem:[%s223_s17] sm:$0x1]  ;;  %s1456_s24 = sld [smem:[#allocation4 + $0x780]]  ;;  %s153_s25 = scalar_lea.vmem [#allocation7], %s1566_s13  ;;  %v321_v40 = vsel %vm307_vm0, %v194_v34, %v287_v32 }
  0x70   :  { %v154_v38 = vld [vmem:[%s153_s25] sm:$0x1]  ;;  %s230_s20 = scalar_select %p229_p11, %s1440_s0, 0  ;;  %v293_v42 = vrot.slane %v224_v36, 5  ;;  %v322_v45 = vsel %vm309_vm1, %v321_v40, %v290_v37  ;;  %v312_v46 = vsel %vm311_vm2, %v310_v41, %v272_v39  ;;  %v1142_v37 = vld [vmem:[%s1549_s7 + $0x28] sm:$0xff]   ;;  %v1144_v39 = vld [vmem:[%s1549_s7 + $0x38] sm:$0xff]  }
  0x71   :  { %p239_p13 = scmp.gt.s32.totalorder %s1442_s12, 0  ;;  %p930_p0 = scmp.lt.s32.totalorder %s1442_s12, 127  ;;  %v275_v44 = vrot.slane %v154_v38, 4  ;;  %v1141_v36 = vld [vmem:[%s1549_s7 + $0x20] sm:$0xff]   ;;  %v1143_v38 = vld [vmem:[%s1549_s7 + $0x30] sm:$0xff]  }
  0x72   :  { %s1588_s20 = smov (!%p924_p12, %s230_s20), 127  ;;  %s163_s27 = scalar_lea.vmem [#allocation7], %s1570_s22  ;;  %v323_v51 = vsel %vm311_vm2, %v322_v45, %v293_v42  ;;  %v964_v41 = vld [vmem:[%s1548_s6] ss:$0 sm:$0xff] }
  0x73   :  { %v164_v43 = vld [vmem:[%s163_s27] sm:$0x1]  ;;  %s240_s28 = scalar_select %p239_p13, %s1442_s12, 0  ;;  %v314_v52 = vsel %vm313_vm3, %v312_v46, %v275_v44 }
  0x74   :  { %p249_p1 = scmp.gt.s32.totalorder %s1449_s19, 0  ;;  %s233_s29 = scalar_lea.vmem [#allocation7], %s1588_s20  ;;  %v278_v49 = vrot.slane %v164_v43, 3 }
  0x75   :  { %v234_v47 = vld [vmem:[%s233_s29] sm:$0x1]  ;;  %s1590_s28 = smov (!%p930_p0, %s240_s28), 127  ;;  %s173_s30 = scalar_lea.vmem [#allocation7], %s1572_s16 }
  0x76   :  { %v174_v48 = vld [vmem:[%s173_s30] sm:$0x1]  ;;  %s250_s22 = scalar_select %p249_p1, %s1449_s19, 0  ;;  %v296_v50 = vrot.slane %v234_v47, 4  ;;  %v316_v58 = vsel %vm315_vm4, %v314_v52, %v278_v49 }
  0x77   :  { %p936_p2 = scmp.lt.s32.totalorder %s1449_s19, 127  ;;  %s243_s13 = scalar_lea.vmem [#allocation7], %s1590_s28  ;;  %v281_v55 = vrot.slane %v174_v48, 2  ;;  %v981_v52 = vld [vmem:[%s1550_s8] ss:$0 sm:$0xff] }
  0x78   :  { %v244_v53 = vld [vmem:[%s243_s13] sm:$0x1]  ;;  %p259_p3 = scmp.gt.s32.totalorder %s1456_s24, 0  ;;  %p942_p4 = scmp.lt.s32.totalorder %s1456_s24, 127  ;;  %v324_v57 = vsel %vm313_vm3, %v323_v51, %v296_v50 }
  0x79   :  { %s183_s14 = scalar_lea.vmem [#allocation7], %s1586_s3  ;;  %s1592_s22 = smov (!%p936_p2, %s250_s22), 127  ;;  %v299_v56 = vrot.slane %v244_v53, 3  ;;  %v318_v63 = vsel %vm317_vm5, %v316_v58, %v281_v55 }
  0x7a   :  { %v184_v54 = vld [vmem:[%s183_s14] sm:$0x1]  ;;  %s1594_s24 = smov (!%p259_p3, %s1456_s24), 0  ;;  %s253_s16 = scalar_lea.vmem [#allocation7], %s1592_s22 }
  0x7b   :  { %v254_v59 = vld [vmem:[%s253_s16] sm:$0x1]  ;;  %s1596_s24 = smov (!%p942_p4, %s1594_s24), 127  ;;  %v284_v60 = vrot.slane %v184_v54, 1  ;;  %v325_v61 = vsel %vm315_vm4, %v324_v57, %v299_v56 }
  0x7c   :  { %v302_v62 = vrot.slane %v254_v59, 2  ;;  %s263_s3 = scalar_lea.vmem [#allocation7], %s1596_s24 }
  0x7d   :  { %v264_v0 = vld [vmem:[%s263_s3] sm:$0x1]  ;;  %v320_v3 = vsel %vm319_vm6, %v318_v63, %v284_v60 }
  0x7e   :  { %v326_v1 = vsel %vm317_vm5, %v325_v61, %v302_v62  ;;  %v305_v2 = vrot.slane %v264_v0, 1 }
  0x80   :  { %v327_v4 = vsel %vm319_vm6, %v326_v1, %v305_v2 }
  0x81   :  { %v328_v5 = vpack.c.bf16 %v327_v4, %v320_v3 }
  0x83   :  { %500 = vmatmul.mubr.bf16.vlgmr.msra.gmra.mrb[0].mxu0 %v328_v5 }
  0x84   :  { %1076 = vmatpush3.bf16.msra.mxu0 %v1137_v19  ;;  %1091 = vmatprep.mubr.msk.bf16.mxu0 %vm1246_vm7, %v1245_v20 }
  0x85   :  { %1077 = vmatprep.subr.bf16.mxu0 %v1245_v20 }
  0x88   :  { %1078 = vmatpush3.bf16.msra.mxu0 %v1138_v21 }
  0x89   :  { %1079 = vmatprep.subr.bf16.mxu0 %v1245_v20 }
  0x8c   :  { %1080 = vmatpush3.bf16.msra.mxu0 %v1139_v22 }
  0x8d   :  { %1081 = vmatprep.subr.bf16.mxu0 %v1245_v20 }
  0x90   :  { %1082 = vmatpush3.bf16.msra.mxu0 %v1140_v35 }
  0x91   :  { %1083 = vmatprep.subr.bf16.mxu0 %v1245_v20 }
  0x94   :  { %1084 = vmatpush3.bf16.msra.mxu0 %v1141_v36 }
  0x95   :  { %1085 = vmatprep.subr.bf16.mxu0 %v1245_v20 }
  0x98   :  { %1086 = vmatpush3.bf16.msra.mxu0 %v1142_v37 }
  0x99   :  { %1087 = vmatprep.subr.bf16.mxu0 %v1245_v20 }
  0x9c   :  { %1088 = vmatpush3.bf16.msra.mxu0 %v1143_v38 }
  0x9d   :  { %1089 = vmatprep.subr.bf16.mxu0 %v1245_v20 }
  0xa0   :  { %1090 = vmatpush3.bf16.msra.mxu0 %v1144_v39 }
 0x156   :  { %v1038_v23 = vpop.f32.mrb[0].mxu0 }
 0x157   :  { %v1039_v25 = vpop.f32.mrb[1].mxu0 }
 0x158   :  { %v1040_v26 = vadd.f32 %v1039_v25, %v1038_v23  ;;  %v1041_v27 = vpop.f32.mrb[2].mxu0 }
 0x159   :  { %v1042_v28 = vpop.f32.mrb[3].mxu0 }
 0x15a   :  { %v502_v29 = vadd.f32 %v1040_v26, %v947_v24  ;;  %v1043_v30 = vadd.f32 %v1042_v28, %v1041_v27 }
 0x15c   :  { %1145 = vtanh.f32 %v502_v29  ;;  %v505_v31 = vadd.f32 %v1043_v30, %v947_v24 }
 0x15e   :  { %1147 = vtanh.f32 %v505_v31 }
 0x166   :  { %v1146_v32 = vpop.eup %1145 }
 0x167   :  { %706 = vst [vmem:[%s1552_s10] sm:$0xff] %v1146_v32 }
 0x168   :  { %v1148_v33 = vpop.eup %1147 }
 0x169   :  { %707 = vst [vmem:[%s1552_s10 + $0x8] sm:$0xff] %v1148_v33  ;;  %v512_v34 = vpack.c.bf16 %v1148_v33, %v1146_v32 }
 0x16b   :  { %685 = vmatmul.mubr.bf16.vlgmr.msra.gmra.mrb[0].mxu1 %v512_v34 }
 0x23e   :  { %v1060_v40 = vpop.f32.mrb[0].mxu1 }
 0x23f   :  { %v1061_v42 = vpop.f32.mrb[1].mxu1 }
 0x240   :  { %v1062_v43 = vadd.f32 %v1061_v42, %v1060_v40  ;;  %v1063_v44 = vpop.f32.mrb[2].mxu1 }
 0x241   :  { %v1064_v45 = vpop.f32.mrb[3].mxu1 }
 0x242   :  { %v687_v46 = vadd.f32 %v1062_v43, %v964_v41  ;;  %v1065_v47 = vadd.f32 %v1064_v45, %v1063_v44 }
 0x244   :  { %1149 = vtanh.f32 %v687_v46  ;;  %v690_v48 = vadd.f32 %v1065_v47, %v964_v41 }
 0x246   :  { %1151 = vtanh.f32 %v690_v48 }
 0x24e   :  { %v1150_v49 = vpop.eup %1149 }
 0x24f   :  { %708 = vst [vmem:[%s1552_s10 + $0x10] sm:$0xff] %v1150_v49 }
 0x250   :  { %v1152_v50 = vpop.eup %1151 }
 0x251   :  { %709 = vst [vmem:[%s1552_s10 + $0x18] sm:$0xff] %v1152_v50  ;;  %v697_v51 = vpack.c.bf16 %v1152_v50, %v1150_v49 }
 0x253   :  { %1092 = vmatmul.mubr.bf16.vlgmr.msra.gmra.mrb[4].mxu0 %v697_v51 }
 0x326   :  { %v816_v53 = vpop.f32.mrb[4].mxu0 }
 0x327   :  { %v817_v54 = vadd.f32 %v981_v52, %v816_v53  ;;  %v1093_v55 = vpop.f32.mrb[5].mxu0 }
 0x328   :  { %v819_v56 = vpop.f32.mrb[6].mxu0 }
 0x329   :  { %823 = vst [vmem:[%s1551_s9] sm:$0xff] %v817_v54  ;;  %v820_v57 = vadd.f32 %v981_v52, %v819_v56  ;;  %v1094_v58 = vpop.f32.mrb[7].mxu0 }
 0x32b   :  { %824 = vst [vmem:[%s1551_s9 + $0x8] sm:$0xff] %v820_v57 }
 0x32c   :  { %833 = vsyncpa [#allocation5], 1 }
 0x32d   :  { %834 = vsyncpa [#allocation9], 1 }
 0x32e   :  { %835 = vsyncpa [#allocation6], 1 }

</bundles_post_ra>
